<compile_context>
chip_gen: v7x
topology: tpu7x:2x2x1
jax: 0.10.0
libtpu: 0.0.40
codegen_flags: <defaults>
</compile_context>

<pallas_src>
import math
import functools

import jax
import jax.numpy as jnp
from jax import lax
from jax.experimental import pallas as pl
from jax.experimental.pallas import tpu as pltpu


# ----------------------------------------------------------------------------
# Kernels
# ----------------------------------------------------------------------------
def _pos_enc_eval_kernel(x_ref, pe_ref, o_ref):
    # x_ref: (tS, tB, E), pe_ref: (tS, 1, E) -> sublane-splat broadcast over batch.
    o_ref[...] = (x_ref[...] + pe_ref[...]).astype(o_ref.dtype)


def _pos_enc_dropout_kernel(seed_ref, x_ref, pe_ref, o_ref, *,
                            total_b, keep_threshold, scale):
    tS, tB, tE = x_ref.shape
    y = x_ref[...] + pe_ref[...]                      # (tS, tB, E)

    # Stateless counter-based PRNG: hash (seed, global element index) with a
    # 32-bit mixer (lowbias32).  Plain integer VPU ops -> lowers on Mosaic and
    # in interpret mode alike; per-tile masks are independent by construction.
    # TODO(synk): PyTorch's RNG stream is not reproduced bit-exactly.
    s_off = pl.program_id(0) * tS
    b_off = pl.program_id(1) * tB
    s_idx = s_off + lax.broadcasted_iota(jnp.int32, y.shape, 0)
    b_idx = b_off + lax.broadcasted_iota(jnp.int32, y.shape, 1)
    e_idx = lax.broadcasted_iota(jnp.int32, y.shape, 2)
    # Flat global index; for arrays > 2^32 elements this wraps, which only
    # perturbs the hash input (stream stays pseudorandom).
    idx = (s_idx * total_b + b_idx) * tE + e_idx

    h = idx.astype(jnp.uint32) ^ (seed_ref[0].astype(jnp.uint32)
                                  * jnp.uint32(0x9E3779B1))
    h = h ^ (h >> 16)
    h = h * jnp.uint32(0x7FEB352D)
    h = h ^ (h >> 15)
    h = h * jnp.uint32(0x846CA68B)
    h = h ^ (h >> 16)

    # Keep with prob (1 - p): P(top-31 bits >= round(p * 2^31)) = 1 - p
    # (<= 2^-31 bias from the rounding, negligible).
    keep = (h >> 1).astype(jnp.int32) >= jnp.int32(keep_threshold)
    y = jnp.where(keep, y * jnp.asarray(scale, dtype=y.dtype), jnp.zeros_like(y))
    o_ref[...] = y.astype(o_ref.dtype)


# ----------------------------------------------------------------------------
# Parameter setup (same math as the PyTorch __init__, done once in plain JAX).
# Returned table is (max_len, 1, embed_size), pre-cast to the activation dtype
# so the forward pass never re-slices or re-converts it.
# ----------------------------------------------------------------------------
def make_positional_encoding_table(max_len, embed_size, dtype=jnp.float32):
    position = jnp.arange(max_len, dtype=jnp.float32)[:, None]           # (L, 1)
    div_term = jnp.exp(
        jnp.arange(0, embed_size, 2, dtype=jnp.float32)
        * (-math.log(10000.0) / embed_size)
    )
    pe = jnp.zeros((max_len, embed_size), dtype=jnp.float32)
    pe = pe.at[:, 0::2].set(jnp.sin(position * div_term))
    # Guard odd embed_size (the PyTorch original would raise here).
    pe = pe.at[:, 1::2].set(jnp.cos(position * div_term)[:, : embed_size // 2])
    return pe.astype(dtype)[:, None, :]                                   # (L, 1, E)


# ----------------------------------------------------------------------------
# Tiling: padded-VMEM-aware block sizing over a 2-D (S, B) grid.
# ----------------------------------------------------------------------------
def _round_up(n, m):
    return ((n + m - 1) // m) * m


def _sublane_multiple(dtype):
    itemsize = jnp.dtype(dtype).itemsize
    return max(8, 32 // itemsize)        # f32: 8, bf16: 16, int8/fp8: 32


def _padded_block_bytes(tS, tB, E, dtype):
    itemsize = jnp.dtype(dtype).itemsize
    sub = _sublane_multiple(dtype)
    return tS * _round_up(tB, sub) * _round_up(E, 128) * itemsize


_TARGET_BLOCK_BYTES = 2 << 20   # padded bytes per x block (conservative on all gens)


def _choose_tiles(S, B, E, dtype, target_bytes=_TARGET_BLOCK_BYTES):
    """Pick (tS, tB) so one padded x block is ~target_bytes."""
    itemsize = jnp.dtype(dtype).itemsize
    sub = _sublane_multiple(dtype)
    pE = _round_up(E, 128)
    row_bytes = _round_up(B, sub) * pE * itemsize      # padded bytes for tS=1, full B

    if row_bytes <= target_bytes:
        tB = B
        tS = min(S, max(1, target_bytes // row_bytes))
    else:
        # One sequence row is already too big: split the batch axis as well.
        tS = 1
        per_sub = sub * pE * itemsize
        tB = max(sub, (target_bytes // per_sub) * sub)
        tB = min(tB, B)

    # Keep a few grid steps for non-trivial arrays so v7x can shard the grid
    # across its two TensorCores and the DMA pipeline has work to overlap.
    total_padded = _padded_block_bytes(S, B, E, dtype)
    steps = math.ceil(S / tS) * math.ceil(B / tB)
    if total_padded > (4 << 20) and steps < 8:
        desired = min(8, S)
        tS = max(1, min(tS, math.ceil(S / desired)))
    return tS, tB


# ----------------------------------------------------------------------------
# Wrapper
# ----------------------------------------------------------------------------
def positional_encoding_forward(x, pe_table, *, dropout_p=0.1, training=False,
                                seed=0, tile_s=None, tile_b=None,
                                donate_x=False):
    """x: (S, B, E). pe_table: (max_len, 1, E) or (max_len, E).

    Returns dropout(x + pe[:S]).  Set donate_x=True only if the caller actually
    donates x (e.g. jit donate_argnums); otherwise XLA inserts a defensive copy
    that costs more bandwidth than it saves.
    """
    S, B, E = x.shape
    if pe_table.ndim == 2:
        pe_table = pe_table[:, None, :]                 # (L, 1, E), free reshape
    assert pe_table.shape[0] >= S and pe_table.shape[-1] == E
    if pe_table.dtype != x.dtype:
        # Prefer building the table in the activation dtype at init time; this
        # fallback costs an extra pe read+write per call.
        pe_table = pe_table.astype(x.dtype)

    tS, tB = _choose_tiles(S, B, E, x.dtype)
    if tile_s is not None:
        tS = max(1, min(int(tile_s), S))
    if tile_b is not None:
        sub = _sublane_multiple(x.dtype)
        tB = int(tile_b)
        tB = B if tB >= B else max(sub, (tB // sub) * sub)

    grid = (pl.cdiv(S, tS), pl.cdiv(B, tB))

    x_spec = pl.BlockSpec((tS, tB, E), lambda s, b: (s, b, 0))
    pe_spec = pl.BlockSpec((tS, 1, E), lambda s, b: (s, 0, 0))
    out_spec = pl.BlockSpec((tS, tB, E), lambda s, b: (s, b, 0))
    out_shape = jax.ShapeDtypeStruct((S, B, E), x.dtype)

    # Elementwise, reduction-free: every grid step is independent.
    x_blk = _padded_block_bytes(tS, tB, E, x.dtype)
    pe_blk = _padded_block_bytes(tS, 1, E, x.dtype)
    vmem_needed = 4 * x_blk + 2 * pe_blk + (2 << 20)    # 2x in + 2x out + 2x pe + headroom
    compiler_kwargs = dict(dimension_semantics=("parallel", "parallel"))
    if vmem_needed > (16 << 20):   # raise only above the most conservative default (v5e)
        compiler_kwargs["vmem_limit_bytes"] = int(min(vmem_needed, 48 << 20))
    compiler_params = pltpu.CompilerParams(**compiler_kwargs)

    itemsize = jnp.dtype(x.dtype).itemsize
    xbytes = S * B * E * itemsize
    pbytes = S * E * itemsize
    apply_dropout = bool(training) and float(dropout_p) > 0.0

    if not apply_dropout:
        cost = pl.CostEstimate(flops=S * B * E, transcendentals=0,
                               bytes_accessed=2 * xbytes + pbytes)
        return pl.pallas_call(
            _pos_enc_eval_kernel,
            out_shape=out_shape,
            grid=grid,
            in_specs=[x_spec, pe_spec],
            out_specs=out_spec,
            compiler_params=compiler_params,
            cost_estimate=cost,
            input_output_aliases=({0: 0} if donate_x else {}),
        )(x, pe_table)

    p = float(dropout_p)
    if p >= 1.0:                          # degenerate: drop everything
        return jnp.zeros_like(x)
    keep_threshold = min(int(round(p * 2 ** 31)), 2 ** 31 - 1)
    scale = 1.0 / (1.0 - p)
    kernel = functools.partial(_pos_enc_dropout_kernel, total_b=B,
                               keep_threshold=keep_threshold, scale=scale)
    seed_arr = jnp.asarray([seed], dtype=jnp.int32)
    cost = pl.CostEstimate(flops=10 * S * B * E, transcendentals=0,
                           bytes_accessed=2 * xbytes + pbytes)
    return pl.pallas_call(
        kernel,
        out_shape=out_shape,
        grid=grid,
        in_specs=[pl.BlockSpec(memory_space=pltpu.MemorySpace.SMEM),   # seed
                  x_spec, pe_spec],
        out_specs=out_spec,
        compiler_params=compiler_params,
        cost_estimate=cost,
        input_output_aliases=({1: 0} if donate_x else {}),
    )(seed_arr, x, pe_table)


if __name__ == "__main__":
    # --- Small deterministic example (module layout: (seq_len, batch, embed)) ---
    S, B, E = 8, 2, 32
    MAX_LEN = 64
    key = jax.random.PRNGKey(0)
    x = jax.random.normal(key, (S, B, E), dtype=jnp.float32)
    pe_table = make_positional_encoding_table(MAX_LEN, E, dtype=x.dtype)   # (64,1,32)

    # Eval mode (dropout is identity), matching model.eval() semantics.
    out = jax.block_until_ready(
        positional_encoding_forward(x, pe_table, dropout_p=0.1, training=False))
    ref = x + pe_table[:S]                                                 # (S,B,E)
    assert out.shape == (S, B, E)
    assert jnp.allclose(out, ref, atol=1e-6, rtol=1e-6), "eval mismatch"

    # Multi-tile grid path (several S tiles, lane-dense (8,128) blocks).
    S2, B2, E2 = 64, 8, 128
    x2 = jax.random.normal(jax.random.PRNGKey(1), (S2, B2, E2), dtype=jnp.float32)
    pe2 = make_positional_encoding_table(128, E2, dtype=x2.dtype)
    out2 = jax.block_until_ready(
        positional_encoding_forward(x2, pe2, training=False, tile_s=16))
    ref2 = x2 + pe2[:S2]
    assert jnp.allclose(out2, ref2, atol=1e-6, rtol=1e-6), "tiled eval mismatch"

    # Training mode (inverted dropout): every kept entry must equal ref/(1-p).
    p = 0.5
    out_tr = jax.block_until_ready(
        positional_encoding_forward(x, pe_table, dropout_p=p, training=True,
                                    seed=42))
    scaled_ref = ref * (1.0 / (1.0 - p))
    kept = out_tr != 0.0
    kept_ok = jnp.where(kept, jnp.isclose(out_tr, scaled_ref, atol=1e-5, rtol=1e-5),
                        True)
    assert bool(jnp.all(kept_ok)), "dropout mismatch on kept entries"
    frac = float(jnp.mean(kept.astype(jnp.float32)))
    assert 0.15 < frac < 0.85, f"dropout keep fraction implausible: {frac}"

    # Training mode across multiple tiles (independent mask per block).
    out_tr2 = jax.block_until_ready(
        positional_encoding_forward(x2, pe2, dropout_p=p, training=True,
                                    seed=7, tile_s=16))
    scaled_ref2 = ref2 * (1.0 / (1.0 - p))
    kept2 = out_tr2 != 0.0
    kept_ok2 = jnp.where(kept2,
                         jnp.isclose(out_tr2, scaled_ref2, atol=1e-5, rtol=1e-5),
                         True)
    assert bool(jnp.all(kept_ok2)), "tiled dropout mismatch on kept entries"
    frac2 = float(jnp.mean(kept2.astype(jnp.float32)))
    assert 0.4 < frac2 < 0.6, f"tiled dropout keep fraction implausible: {frac2}"

    print("KERNEL_OK")
</pallas_src>

<mosaic_0001>
module attributes {stable_mosaic.version = 11 : i64} {
  func.func @_pos_enc_eval_kernel(%arg0: i32, %arg1: i32, %arg2: memref<8x2x32xf32, #tpu.memory_space<vmem>>, %arg3: memref<8x1x32xf32, #tpu.memory_space<vmem>>, %arg4: memref<8x2x32xf32, #tpu.memory_space<vmem>>) attributes {dimension_semantics = [#tpu.dimension_semantics<parallel>, #tpu.dimension_semantics<parallel>], iteration_bounds = array<i64: 1, 1>, scalar_prefetch = 0 : i64, scratch_operands = 0 : i64, tpu.core_type = #tpu.core_type<tc>, window_params = [{transform_indices = @transform_0, window_bounds = array<i64: 8, 2, 32>}, {transform_indices = @transform_1, window_bounds = array<i64: 8, 1, 32>}, {transform_indices = @transform_2, window_bounds = array<i64: 8, 2, 32>}]} {
    %c0 = arith.constant 0 : index
    %c0_0 = arith.constant 0 : index
    %c0_1 = arith.constant 0 : index
    %0 = vector.load %arg2[%c0, %c0_0, %c0_1] : memref<8x2x32xf32, #tpu.memory_space<vmem>>, vector<8x2x32xf32>
    %c0_2 = arith.constant 0 : index
    %c0_3 = arith.constant 0 : index
    %c0_4 = arith.constant 0 : index
    %1 = vector.load %arg3[%c0_2, %c0_3, %c0_4] : memref<8x1x32xf32, #tpu.memory_space<vmem>>, vector<8x1x32xf32>
    %2 = vector.broadcast %1 : vector<8x1x32xf32> to vector<8x2x32xf32>
    %3 = arith.addf %0, %2 : vector<8x2x32xf32>
    %c0_5 = arith.constant 0 : index
    %c0_6 = arith.constant 0 : index
    %c0_7 = arith.constant 0 : index
    %4 = vector.load %arg4[%c0_5, %c0_6, %c0_7] : memref<8x2x32xf32, #tpu.memory_space<vmem>>, vector<8x2x32xf32>
    tpu.vector_store %arg4[%c0_5, %c0_6, %c0_7], %3 {strides = array<i32>} : memref<8x2x32xf32, #tpu.memory_space<vmem>>, vector<8x2x32xf32>,
    return
  }
  func.func @transform_0(%arg0: i32, %arg1: i32) -> (i32, i32, i32) {
    %c0_i32 = arith.constant 0 : i32
    %c0_i32_0 = arith.constant 0 : i32
    return %arg0, %arg1, %c0_i32 : i32, i32, i32
  }
  func.func @transform_1(%arg0: i32, %arg1: i32) -> (i32, i32, i32) {
    %c0_i32 = arith.constant 0 : i32
    %c0_i32_0 = arith.constant 0 : i32
    %c0_i32_1 = arith.constant 0 : i32
    return %arg0, %c0_i32, %c0_i32_0 : i32, i32, i32
  }
  func.func @transform_2(%arg0: i32, %arg1: i32) -> (i32, i32, i32) {
    %c0_i32 = arith.constant 0 : i32
    %c0_i32_0 = arith.constant 0 : i32
    return %arg0, %arg1, %c0_i32 : i32, i32, i32
  }
}

</mosaic_0001>

<bundles_post_ra>
// kernel: tpu_custom_call.1
= control target key start
LH: loop header
LB: loop body
LE: loop exit
PB: predicated region body
PF: predicated region fallthrough
CT: control target
= control target key end

     0   :  { %vm84_vm0 = vcmask 254976   ;;  %s230_s0 = inlined_call_operand.vmem [shape: f32[8,2,32], index: 0, kind: input, shape index: {}]   ;;  %s231_s1 = inlined_call_operand.vmem [shape: f32[64,1,32], index: 1, kind: input, shape index: {}]   ;;  %s232_s2 = inlined_call_operand.hbm [shape: f32[8,2,32], index: 2, kind: output, shape index: {}]  }
   0x1   :  { %v12_v0 = vld [vmem:[%s230_s0] sm:$0x3]  ;;  %v13_v3 = vld [vmem:[%s230_s0 + $0x2] sm:$0x3]  ;;  %v14_v5 = vld [vmem:[%s230_s0 + $0x4] sm:$0x3] }
   0x2   :  { %v109_v1 = vld [vmem:[%s231_s1] ss:$0 sm:$0xff]  ;;  %v110_v4 = vld [vmem:[%s231_s1 + $0x1] ss:$0 sm:$0xff]  ;;  %v111_v7 = vld [vmem:[%s231_s1 + $0x2] ss:$0 sm:$0xff] }
   0x3   :  { %v76_v2 = vadd.f32 %v109_v1, %v12_v0  ;;  %v77_v6 = vadd.f32 %v110_v4, %v13_v3  ;;  %v15_v8 = vld [vmem:[%s230_s0 + $0x6] sm:$0x3]  ;;  %v112_v9 = vld [vmem:[%s231_s1 + $0x3] ss:$0 sm:$0xff]  ;;  %v78_v10 = vadd.f32 %v111_v7, %v14_v5  ;;  %v16_v12 = vld [vmem:[%s230_s0 + $0x8] sm:$0x3] }
   0x4   :  { %v79_v11 = vadd.f32 %v112_v9, %v15_v8  ;;  %v113_v13 = vld [vmem:[%s231_s1 + $0x4] ss:$0 sm:$0xff]  ;;  %v17_v14 = vld [vmem:[%s230_s0 + $0xa] sm:$0x3]  ;;  %v114_v16 = vld [vmem:[%s231_s1 + $0x5] ss:$0 sm:$0xff] }
   0x5   :  { %85 = vst.msk [vmem:[#allocation2] sm:$0x3] %vm84_vm0, %v76_v2  ;;  %86 = vst.msk [vmem:[#allocation2 + $0x2] sm:$0x3] %vm84_vm0, %v77_v6  ;;  %v80_v15 = vadd.f32 %v113_v13, %v16_v12  ;;  %v18_v17 = vld [vmem:[%s230_s0 + $0xc] sm:$0x3]  ;;  %v81_v19 = vadd.f32 %v114_v16, %v17_v14 }
   0x6   :  { %v115_v18 = vld [vmem:[%s231_s1 + $0x6] ss:$0 sm:$0xff]  ;;  %87 = vst.msk [vmem:[#allocation2 + $0x4] sm:$0x3] %vm84_vm0, %v78_v10  ;;  %88 = vst.msk [vmem:[#allocation2 + $0x6] sm:$0x3] %vm84_vm0, %v79_v11 }
   0x7   :  { %v82_v20 = vadd.f32 %v115_v18, %v18_v17  ;;  %v19_v21 = vld [vmem:[%s230_s0 + $0xe] sm:$0x3]  ;;  %v116_v22 = vld [vmem:[%s231_s1 + $0x7] ss:$0 sm:$0xff] }
   0x8   :  { %7 = vsyncpa [#allocation3], 0  ;;  %89 = vst.msk [vmem:[#allocation2 + $0x8] sm:$0x3] %vm84_vm0, %v80_v15  ;;  %v83_v23 = vadd.f32 %v116_v22, %v19_v21  ;;  %s144_s13 = smov [#allocation2]  }
   0x9   :  { %s98_s14 = sshll.u32 %s144_s13, 4  ;;  %90 = vst.msk [vmem:[#allocation2 + $0xa] sm:$0x3] %vm84_vm0, %v81_v19  ;;  %91 = vst.msk [vmem:[#allocation2 + $0xc] sm:$0x3] %vm84_vm0, %v82_v20  ;;  %s99_s14 = int_to_ptr.vmem [resolvable:$true] %s98_s14 }
   0xa   :  { %92 = vst.msk [vmem:[#allocation2 + $0xe] sm:$0x3] %vm84_vm0, %v83_v23  ;;  %s120_s15 = scalar_lea.vmem %s99_s14, 256  ;;  %p125_p1 = scmp.lt.s32.totalorder %s99_s14, %s99_s14 }
   0xb   :  { %p121_p0 = scmp.ne.s32.totalorder %s99_s14, %s120_s15  ;;  %p126_p2 = scmp.lt.s32.totalorder %s120_s15, %s120_s15 }
   0xd   :  { %p127_p3 = por %p126_p2, %p125_p1 }
   0xf   :  { %p128_p4 = pnand %p127_p3, %p121_p0 }
  0x11   :  { %131 = shalt.err (!%p128_p4)
}
  0x12   :  { %s132_s16 = scalar_lea.hbm %s232_s2, 256 }
  0x13   :  { %p133_p5 = scmp.ne.s32.totalorder %s232_s2, %s132_s16  ;;  %p136_p6 = scmp.lt.u32.totalorder %s132_s16, %s232_s2 }
  0x15   :  { %p138_p7 = pnand %p136_p6, %p133_p5 }
  0x17   :  { %141 = shalt.err (!%p138_p7)
}
  0x18   :  { %s145_s21 = smov 32   ;;  %s146_s22 = smov 2  }
  0x19   :  { %104 = dma.vmem_to_hbm [thread:$0]  %s99_s14, 256, %s232_s2, [#allocation3], %s145_s21, %s145_s21, %s146_s22  }
  0x1a   :  { %142 = dma.done.wait [#allocation3], 256  }
  0x1b   :  { %143 = vsyncadd [#allocation3], 4294967040 }
  0x1c   :  { %108 = vsyncpa [#allocation3], 1 }

</bundles_post_ra>
